<compile_context>
chip_gen: v6e
topology: v6e:2x2x1
jax: 0.10.0
libtpu: 0.0.40
codegen_flags: <defaults>
</compile_context>

<pallas_src>
import functools

import jax
import jax.numpy as jnp
from jax.experimental import pallas as pl
from jax.experimental.pallas import tpu as pltpu


def _conv3x3_kernel(col_ref, x_ref, w_ref, *rest, W, T, Cpad, has_bias):
    """One grid step: halo window -> (tco, T) output slab via a single matmul.

    col_ref : (1, T) int32          precomputed column index of each position
    x_ref   : (1, 1, Cpad, T+2W+2)  flat-padded input window (halo included)
    w_ref   : (tco, 9*Cpad)         folded weights, K index = (a*3+b)*Cpad + ci
    b_ref   : (tco, 1)              bias (only present when has_bias)
    o_ref   : (1, tco, T)
    cols_ref: (9*Cpad, T)           VMEM im2col scratch
    """
    if has_bias:
        b_ref, o_ref, cols_ref = rest
    else:
        o_ref, cols_ref = rest
        b_ref = None

    win = x_ref[0, 0]                       # (Cpad, T + 2W + 2), native dtype

    # Left/right column masks (top/bottom are handled by the flat zero-pad).
    col = col_ref[...]                      # (1, T) int32, no in-kernel mod
    left = col == 0
    right = col == W - 1

    # Build the im2col slab: 9 static lane-offset slices of the window, masked
    # on the (small, Cin-sized) input side, stored at 8-aligned sublane rows.
    for a in range(3):
        for b in range(3):
            tap = a * 3 + b
            off = a * W + b                 # static lane offset
            sl = win[:, off:off + T]        # (Cpad, T)
            if b == 0:
                sl = jnp.where(left, 0, sl)
            elif b == 2:
                sl = jnp.where(right, 0, sl)
            cols_ref[tap * Cpad:(tap + 1) * Cpad, :] = sl

    # Single MXU matmul, K = 9*Cpad, f32 accumulation, native-dtype operands.
    acc = jnp.dot(w_ref[...], cols_ref[...],
                  preferred_element_type=jnp.float32)      # (tco, T)
    if has_bias:
        acc = acc + b_ref[...].astype(jnp.float32)
    o_ref[0] = acc.astype(o_ref.dtype)


def overlap_patch_embed(x, weight, bias=None):
    """3x3 / stride-1 / pad-1 conv, NCHW in -> NCHW out (OverlapPatchEmbed)."""
    B, Cin, H, W = x.shape
    Cout = weight.shape[0]
    assert weight.shape == (Cout, Cin, 3, 3)
    HW = H * W
    Cpad = -(-Cin // 8) * 8                 # channels rounded up to sublane tile
    halo = 2 * W + 2                        # flat-pad halo for the 9 tap shifts
    HWp = HW + halo

    in_dt = x.dtype
    out_dt = x.dtype
    isz = jnp.dtype(in_dt).itemsize
    osz = jnp.dtype(out_dt).itemsize
    has_bias = bias is not None

    # ------------- generation-aware VMEM budget & tile selection -------------
    try:
        vmem_cap = int(pltpu.get_tpu_info().vmem_capacity_bytes)
    except Exception:                        # pragma: no cover - conservative
        vmem_cap = 64 * 1024 * 1024
    budget = vmem_cap // 2
    vmem_limit = max(32 * 1024 * 1024, int(vmem_cap * 0.8))

    def fits(tco, T):
        need = (2 * Cpad * (T + halo) * isz      # input window (double buffered)
                + 2 * tco * T * osz              # output block (double buffered)
                + tco * T * 4                    # f32 matmul result
                + 9 * Cpad * T * isz             # im2col scratch
                + Cpad * (T + halo) * isz        # window value
                + Cpad * T * isz                 # per-tap slab temporary
                + 2 * tco * 9 * Cpad * isz       # folded weights
                + 2 * (T * 4 + tco * isz))       # column indices + bias
        return need <= budget

    # Spatial tile: a multiple of 128 dividing HW (lane-dense, unmasked
    # stores); fall back to the whole image if no such divisor exists.
    t_cands = sorted((d for d in range(128, HW + 1, 128) if HW % d == 0),
                     reverse=True) or [HW]
    # Output-channel tile: keep the MXU M dim as big as possible (prefer Cout).
    c_cands = [d for d in range(Cout, 0, -1)
               if Cout % d == 0 and (d % 8 == 0 or d == Cout)]

    tco, T = c_cands[-1], t_cands[-1]
    found = False
    for tc in c_cands:              # prefer full Cout ...
        for t in t_cands:           # ... with the largest spatial tile that fits
            if fits(tc, t):
                tco, T = tc, t
                found = True
                break
        if found:
            break
    n_s = HW // T

    # -------------------- host-side prep (cheap, input-sized) ----------------
    # Flat zero-pad of W+1 on each side bakes the top/bottom conv padding into
    # the layout; channel pad to Cpad keeps every kernel slab sublane-aligned.
    xf = x.reshape(B, Cin, HW)
    xpad = jnp.pad(xf, ((0, 0), (0, Cpad - Cin), (W + 1, W + 1)))  # (B,Cpad,HWp)
    if n_s == 1:
        xwin = xpad[:, None]                                       # (B,1,Cpad,HWp)
    else:
        idx = (jnp.arange(n_s)[:, None] * T
               + jnp.arange(T + halo)[None, :])                    # (n_s, T+halo)
        xwin = jnp.transpose(xpad[:, :, idx], (0, 2, 1, 3))        # (B,n_s,Cpad,T+halo)

    # Folded weights: (Cout, Cin, 3, 3) -> (Cout, 9*Cpad), K = (a*3+b)*Cpad+ci.
    wt = jnp.transpose(weight, (0, 2, 3, 1))                       # (Cout,3,3,Cin)
    wt = jnp.pad(wt, ((0, 0), (0, 0), (0, 0), (0, Cpad - Cin)))
    wmat = wt.reshape(Cout, 9 * Cpad).astype(in_dt)

    # Precomputed column indices (removes the per-step integer modulo).
    colidx = jnp.tile(jnp.arange(W, dtype=jnp.int32), H).reshape(1, HW)

    # ------------------------------ pallas_call ------------------------------
    grid = (B, n_s, Cout // tco)
    kernel = functools.partial(_conv3x3_kernel, W=W, T=T, Cpad=Cpad,
                               has_bias=has_bias)

    in_specs = [
        pl.BlockSpec((1, T), lambda b, s, c: (0, s)),                  # col idx
        # Window block index is constant across the Cout-tile axis, so the
        # input DMA is issued once per (image, spatial tile).
        pl.BlockSpec((1, 1, Cpad, T + halo), lambda b, s, c: (b, s, 0, 0)),
        pl.BlockSpec((tco, 9 * Cpad), lambda b, s, c: (c, 0)),         # weights
    ]
    args = [colidx, xwin, wmat]
    if has_bias:
        in_specs.append(pl.BlockSpec((tco, 1), lambda b, s, c: (c, 0)))
        args.append(jnp.asarray(bias).reshape(Cout, 1).astype(in_dt))

    out = pl.pallas_call(
        kernel,
        out_shape=jax.ShapeDtypeStruct((B, Cout, HW), out_dt),
        grid_spec=pltpu.PrefetchScalarGridSpec(
            num_scalar_prefetch=0,
            grid=grid,
            in_specs=in_specs,
            out_specs=pl.BlockSpec((1, tco, T), lambda b, s, c: (b, c, s)),
            scratch_shapes=[pltpu.VMEM((9 * Cpad, T), in_dt)],
        ),
        compiler_params=pltpu.CompilerParams(
            # No reduction grid axis anymore (K lives inside the single dot),
            # so every axis is independent -> all parallel (megacore-friendly).
            dimension_semantics=("parallel", "parallel", "parallel"),
            vmem_limit_bytes=vmem_limit,
        ),
    )(*args)

    return out.reshape(B, Cout, H, W)


if __name__ == "__main__":
    key = jax.random.PRNGKey(0)
    kx, kw, kb = jax.random.split(key, 3)

    # OverlapPatchEmbed defaults: in_c=3, embed_dim=32, bias=False.
    B, Cin, H, W = 2, 3, 16, 16
    Cout = 32
    x = jax.random.normal(kx, (B, Cin, H, W), dtype=jnp.float32)
    weight = 0.1 * jax.random.normal(kw, (Cout, Cin, 3, 3), dtype=jnp.float32)

    # Reference: XLA conv at highest precision.
    ref = jax.lax.conv_general_dilated(
        x, weight, window_strides=(1, 1), padding=((1, 1), (1, 1)),
        dimension_numbers=("NCHW", "OIHW", "NCHW"),
        precision=jax.lax.Precision.HIGHEST)

    # bias=False path (module default).
    out = jax.block_until_ready(overlap_patch_embed(x, weight))
    assert out.shape == ref.shape
    # Tolerance covers a potential bf16-pass MXU mode for f32 operands; real
    # tap / mask / weight-layout bugs produce O(0.1) errors.
    err = float(jnp.max(jnp.abs(out - ref)))
    assert jnp.allclose(out, ref, atol=5e-3, rtol=5e-3), f"mismatch: {err}"

    # bias=True path.
    bias = 0.1 * jax.random.normal(kb, (Cout,), dtype=jnp.float32)
    out_b = jax.block_until_ready(overlap_patch_embed(x, weight, bias))
    ref_b = ref + bias.reshape(1, Cout, 1, 1)
    err_b = float(jnp.max(jnp.abs(out_b - ref_b)))
    assert jnp.allclose(out_b, ref_b, atol=5e-3, rtol=5e-3), f"mismatch: {err_b}"

    print("KERNEL_OK")
</pallas_src>

<mosaic_0001>
module attributes {stable_mosaic.version = 11 : i64} {
  func.func @_conv3x3_kernel(%arg0: i32, %arg1: i32, %arg2: i32, %arg3: memref<1x256xi32, #tpu.memory_space<vmem>>, %arg4: memref<1x1x8x290xf32, #tpu.memory_space<vmem>>, %arg5: memref<32x72xf32, #tpu.memory_space<vmem>>, %arg6: memref<1x32x256xf32, #tpu.memory_space<vmem>>, %arg7: memref<72x256xf32, #tpu.memory_space<vmem>>) attributes {dimension_semantics = [#tpu.dimension_semantics<parallel>, #tpu.dimension_semantics<parallel>, #tpu.dimension_semantics<parallel>], iteration_bounds = array<i64: 2, 1, 1>, scalar_prefetch = 0 : i64, scratch_operands = 1 : i64, tpu.core_type = #tpu.core_type<tc>, window_params = [{transform_indices = @transform_0, window_bounds = array<i64: 1, 256>}, {transform_indices = @transform_1, window_bounds = array<i64: 1, 1, 8, 290>}, {transform_indices = @transform_2, window_bounds = array<i64: 32, 72>}, {transform_indices = @transform_3, window_bounds = array<i64: 1, 32, 256>}]} {
    %c0 = arith.constant 0 : index
    %c0_0 = arith.constant 0 : index
    %c0_1 = arith.constant 0 : index
    %c0_2 = arith.constant 0 : index
    %0 = vector.load %arg4[%c0, %c0_0, %c0_1, %c0_2] : memref<1x1x8x290xf32, #tpu.memory_space<vmem>>, vector<1x1x8x290xf32>
    %1 = vector.shape_cast %0 : vector<1x1x8x290xf32> to vector<8x290xf32>
    %c0_3 = arith.constant 0 : index
    %c0_4 = arith.constant 0 : index
    %2 = vector.load %arg3[%c0_3, %c0_4] : memref<1x256xi32, #tpu.memory_space<vmem>>, vector<1x256xi32>
    %c0_i32 = arith.constant 0 : i32
    %3 = vector.broadcast %c0_i32 : i32 to vector<1x256xi32>
    %4 = arith.cmpi eq, %2, %3 : vector<1x256xi32>
    %c15_i32 = arith.constant 15 : i32
    %5 = vector.broadcast %c15_i32 : i32 to vector<1x256xi32>
    %6 = arith.cmpi eq, %2, %5 : vector<1x256xi32>
    %7 = vector.extract_strided_slice %1 {offsets = [0, 0], sizes = [8, 256], strides = [1, 1]} : vector<8x290xf32> to vector<8x256xf32>
    %c0_i32_5 = arith.constant 0 : i32
    %8 = arith.sitofp %c0_i32_5 : i32 to f32
    %9 = vector.shape_cast %4 : vector<1x256xi1> to vector<1x256xi1>
    %10 = vector.broadcast %9 : vector<1x256xi1> to vector<8x256xi1>
    %11 = vector.broadcast %8 : f32 to vector<8x256xf32>
    %12 = arith.select %10, %11, %7 : vector<8x256xi1>, vector<8x256xf32>
    %c0_6 = arith.constant 0 : index
    %c0_7 = arith.constant 0 : index
    %13 = vector.load %arg7[%c0_6, %c0_7] : memref<72x256xf32, #tpu.memory_space<vmem>>, vector<8x256xf32>
    tpu.vector_store %arg7[%c0_6, %c0_7], %12 {strides = array<i32>} : memref<72x256xf32, #tpu.memory_space<vmem>>, vector<8x256xf32>,
    %14 = vector.extract_strided_slice %1 {offsets = [0, 1], sizes = [8, 256], strides = [1, 1]} : vector<8x290xf32> to vector<8x256xf32>
    %c8 = arith.constant 8 : index
    %c0_8 = arith.constant 0 : index
    %15 = vector.load %arg7[%c8, %c0_8] : memref<72x256xf32, #tpu.memory_space<vmem>>, vector<8x256xf32>
    tpu.vector_store %arg7[%c8, %c0_8], %14 {strides = array<i32>} : memref<72x256xf32, #tpu.memory_space<vmem>>, vector<8x256xf32>,
    %16 = vector.extract_strided_slice %1 {offsets = [0, 2], sizes = [8, 256], strides = [1, 1]} : vector<8x290xf32> to vector<8x256xf32>
    %c0_i32_9 = arith.constant 0 : i32
    %17 = arith.sitofp %c0_i32_9 : i32 to f32
    %18 = vector.shape_cast %6 : vector<1x256xi1> to vector<1x256xi1>
    %19 = vector.broadcast %18 : vector<1x256xi1> to vector<8x256xi1>
    %20 = vector.broadcast %17 : f32 to vector<8x256xf32>
    %21 = arith.select %19, %20, %16 : vector<8x256xi1>, vector<8x256xf32>
    %c16 = arith.constant 16 : index
    %c0_10 = arith.constant 0 : index
    %22 = vector.load %arg7[%c16, %c0_10] : memref<72x256xf32, #tpu.memory_space<vmem>>, vector<8x256xf32>
    tpu.vector_store %arg7[%c16, %c0_10], %21 {strides = array<i32>} : memref<72x256xf32, #tpu.memory_space<vmem>>, vector<8x256xf32>,
    %23 = vector.extract_strided_slice %1 {offsets = [0, 16], sizes = [8, 256], strides = [1, 1]} : vector<8x290xf32> to vector<8x256xf32>
    %c0_i32_11 = arith.constant 0 : i32
    %24 = arith.sitofp %c0_i32_11 : i32 to f32
    %25 = vector.shape_cast %4 : vector<1x256xi1> to vector<1x256xi1>
    %26 = vector.broadcast %25 : vector<1x256xi1> to vector<8x256xi1>
    %27 = vector.broadcast %24 : f32 to vector<8x256xf32>
    %28 = arith.select %26, %27, %23 : vector<8x256xi1>, vector<8x256xf32>
    %c24 = arith.constant 24 : index
    %c0_12 = arith.constant 0 : index
    %29 = vector.load %arg7[%c24, %c0_12] : memref<72x256xf32, #tpu.memory_space<vmem>>, vector<8x256xf32>
    tpu.vector_store %arg7[%c24, %c0_12], %28 {strides = array<i32>} : memref<72x256xf32, #tpu.memory_space<vmem>>, vector<8x256xf32>,
    %30 = vector.extract_strided_slice %1 {offsets = [0, 17], sizes = [8, 256], strides = [1, 1]} : vector<8x290xf32> to vector<8x256xf32>
    %c32 = arith.constant 32 : index
    %c0_13 = arith.constant 0 : index
    %31 = vector.load %arg7[%c32, %c0_13] : memref<72x256xf32, #tpu.memory_space<vmem>>, vector<8x256xf32>
    tpu.vector_store %arg7[%c32, %c0_13], %30 {strides = array<i32>} : memref<72x256xf32, #tpu.memory_space<vmem>>, vector<8x256xf32>,
    %32 = vector.extract_strided_slice %1 {offsets = [0, 18], sizes = [8, 256], strides = [1, 1]} : vector<8x290xf32> to vector<8x256xf32>
    %c0_i32_14 = arith.constant 0 : i32
    %33 = arith.sitofp %c0_i32_14 : i32 to f32
    %34 = vector.shape_cast %6 : vector<1x256xi1> to vector<1x256xi1>
    %35 = vector.broadcast %34 : vector<1x256xi1> to vector<8x256xi1>
    %36 = vector.broadcast %33 : f32 to vector<8x256xf32>
    %37 = arith.select %35, %36, %32 : vector<8x256xi1>, vector<8x256xf32>
    %c40 = arith.constant 40 : index
    %c0_15 = arith.constant 0 : index
    %38 = vector.load %arg7[%c40, %c0_15] : memref<72x256xf32, #tpu.memory_space<vmem>>, vector<8x256xf32>
    tpu.vector_store %arg7[%c40, %c0_15], %37 {strides = array<i32>} : memref<72x256xf32, #tpu.memory_space<vmem>>, vector<8x256xf32>,
    %39 = vector.extract_strided_slice %1 {offsets = [0, 32], sizes = [8, 256], strides = [1, 1]} : vector<8x290xf32> to vector<8x256xf32>
    %c0_i32_16 = arith.constant 0 : i32
    %40 = arith.sitofp %c0_i32_16 : i32 to f32
    %41 = vector.shape_cast %4 : vector<1x256xi1> to vector<1x256xi1>
    %42 = vector.broadcast %41 : vector<1x256xi1> to vector<8x256xi1>
    %43 = vector.broadcast %40 : f32 to vector<8x256xf32>
    %44 = arith.select %42, %43, %39 : vector<8x256xi1>, vector<8x256xf32>
    %c48 = arith.constant 48 : index
    %c0_17 = arith.constant 0 : index
    %45 = vector.load %arg7[%c48, %c0_17] : memref<72x256xf32, #tpu.memory_space<vmem>>, vector<8x256xf32>
    tpu.vector_store %arg7[%c48, %c0_17], %44 {strides = array<i32>} : memref<72x256xf32, #tpu.memory_space<vmem>>, vector<8x256xf32>,
    %46 = vector.extract_strided_slice %1 {offsets = [0, 33], sizes = [8, 256], strides = [1, 1]} : vector<8x290xf32> to vector<8x256xf32>
    %c56 = arith.constant 56 : index
    %c0_18 = arith.constant 0 : index
    %47 = vector.load %arg7[%c56, %c0_18] : memref<72x256xf32, #tpu.memory_space<vmem>>, vector<8x256xf32>
    tpu.vector_store %arg7[%c56, %c0_18], %46 {strides = array<i32>} : memref<72x256xf32, #tpu.memory_space<vmem>>, vector<8x256xf32>,
    %48 = vector.extract_strided_slice %1 {offsets = [0, 34], sizes = [8, 256], strides = [1, 1]} : vector<8x290xf32> to vector<8x256xf32>
    %c0_i32_19 = arith.constant 0 : i32
    %49 = arith.sitofp %c0_i32_19 : i32 to f32
    %50 = vector.shape_cast %6 : vector<1x256xi1> to vector<1x256xi1>
    %51 = vector.broadcast %50 : vector<1x256xi1> to vector<8x256xi1>
    %52 = vector.broadcast %49 : f32 to vector<8x256xf32>
    %53 = arith.select %51, %52, %48 : vector<8x256xi1>, vector<8x256xf32>
    %c64 = arith.constant 64 : index
    %c0_20 = arith.constant 0 : index
    %54 = vector.load %arg7[%c64, %c0_20] : memref<72x256xf32, #tpu.memory_space<vmem>>, vector<8x256xf32>
    tpu.vector_store %arg7[%c64, %c0_20], %53 {strides = array<i32>} : memref<72x256xf32, #tpu.memory_space<vmem>>, vector<8x256xf32>,
    %c0_21 = arith.constant 0 : index
    %c0_22 = arith.constant 0 : index
    %55 = vector.load %arg5[%c0_21, %c0_22] : memref<32x72xf32, #tpu.memory_space<vmem>>, vector<32x72xf32>
    %c0_23 = arith.constant 0 : index
    %c0_24 = arith.constant 0 : index
    %56 = vector.load %arg7[%c0_23, %c0_24] : memref<72x256xf32, #tpu.memory_space<vmem>>, vector<72x256xf32>
    %cst = arith.constant dense<0.000000e+00> : vector<32x256xf32>
    %57 = tpu.matmul %55, %56, %cst {dimension_numbers = #tpu.dot_dimension_numbers<[1], [0], [0], [1], [0, 0, 1, 1], [], []>} : vector<32x72xf32>, vector<72x256xf32>, vector<32x256xf32> -> vector<32x256xf32>
    %c0_25 = arith.constant 0 : index
    %c0_26 = arith.constant 0 : index
    %c0_27 = arith.constant 0 : index
    %58 = vector.load %arg6[%c0_25, %c0_26, %c0_27] : memref<1x32x256xf32, #tpu.memory_space<vmem>>, vector<1x32x256xf32>
    %59 = vector.shape_cast %58 : vector<1x32x256xf32> to vector<32x256xf32>
    %60 = vector.shape_cast %57 : vector<32x256xf32> to vector<1x32x256xf32>
    tpu.vector_store %arg6[%c0_25, %c0_26, %c0_27], %60 {strides = array<i32>} : memref<1x32x256xf32, #tpu.memory_space<vmem>>, vector<1x32x256xf32>,
    return
  }
  func.func @transform_0(%arg0: i32, %arg1: i32, %arg2: i32) -> (i32, i32) {
    %c0_i32 = arith.constant 0 : i32
    %c0_i32_0 = arith.constant 0 : i32
    return %c0_i32, %arg1 : i32, i32
  }
  func.func @transform_1(%arg0: i32, %arg1: i32, %arg2: i32) -> (i32, i32, i32, i32) {
    %c0_i32 = arith.constant 0 : i32
    %c0_i32_0 = arith.constant 0 : i32
    %c0_i32_1 = arith.constant 0 : i32
    return %arg0, %arg1, %c0_i32, %c0_i32_0 : i32, i32, i32, i32
  }
  func.func @transform_2(%arg0: i32, %arg1: i32, %arg2: i32) -> (i32, i32) {
    %c0_i32 = arith.constant 0 : i32
    %c0_i32_0 = arith.constant 0 : i32
    return %arg2, %c0_i32 : i32, i32
  }
  func.func @transform_3(%arg0: i32, %arg1: i32, %arg2: i32) -> (i32, i32, i32) {
    %c0_i32 = arith.constant 0 : i32
    return %arg0, %arg2, %arg1 : i32, i32, i32
  }
}

</mosaic_0001>

<bundles_post_ra>
// kernel: tpu_custom_call.1
= control target key start
LH: loop header
LB: loop body
LE: loop exit
PB: predicated region body
PF: predicated region fallthrough
CT: control target
= control target key end

     0   :  { %8 = vsyncpa [#allocation4], 0  ;;  %s1327_s0 = inlined_call_operand.hbm [shape: s32[1,256], index: 0, kind: input, shape index: {}]   ;;  %s1328_s1 = inlined_call_operand.hbm [shape: f32[2,1,8,290], index: 1, kind: input, shape index: {}]   ;;  %s1329_s2 = inlined_call_operand.hbm [shape: f32[32,72], index: 2, kind: input, shape index: {}]   ;;  %s1330_s3 = inlined_call_operand.hbm [shape: f32[2,32,256], index: 3, kind: output, shape index: {}]  }
   0x1   :  { %9 = vsyncpa [#allocation7], 0 }
   0x2   :  { %11 = vsyncpa [#allocation7 + $0x1], 0 }
   0x3   :  { %12 = vsyncpa [#allocation5], 0 }
   0x4   :  { %14 = vsyncpa [#allocation5 + $0x1], 0  ;;  %s1053_s12 = smov 0   ;;  %s1055_s13 = smov 0  }
   0x5   :  { %s1057_s14 = smov 0   ;;  %s1059_s15 = smov 0  }
   0x6   :  { %s1061_s16 = smov 0   ;;  %s1063_s17 = smov 0  }
   0x7 LB: > { %s1084_s18 = sadd.s32 4294967295, %s1013_s17   ;;  %s679_s19 = sadd.s32 4294967294, %s1013_s17   ;;  %s1013_s17 = sphi %s1063_s17, %s20_s17   ;;  %s1009_s16 = sphi %s1061_s16, %s1347_s16   ;;  %s1005_s15 = sphi %s1059_s15, %s1346_s15   ;;  %s1001_s14 = sphi %s1057_s14, %s1345_s14   ;;  %s997_s13 = sphi %s1055_s13, %s1344_s13   ;;  %s993_s12 = sphi %s1053_s12, %s1343_s12  }
   0x8   : > { %p87_p0 = scmp.ne.s32.totalorder %s997_s13, %s993_s12  ;;  %p1331_p1 = scmp.eq.s32.totalorder %s1084_s18, 0 }
   0x9   : > { %p147_p2 = scmp.eq.s32.totalorder %s679_s19, 1  ;;  %p680_p4 = scmp.ge.s32.totalorder %s1013_s17, 1 }
   0xa   : > { %p1092_p3 = por %p1331_p1, %p87_p0  ;;  %p154_p6 = scmp.lt.s32.totalorder %s1013_s17, 3 }
   0xb   : > { %p1097_p5 = por %p147_p2, %p87_p0  ;;  %s1015_s23 = smov [#allocation8]  }
   0xc   : > { %p1102_p7 = pnand %p680_p4, %p154_p6  ;;  %s183_s24 = sshll.u32 %s1015_s23, 4  ;;  %s184_s24 = int_to_ptr.vmem [resolvable:$true] %s183_s24 }
   0xd   : > { %s1016_s26 = smov [#allocation3]   ;;  %s856_s28 = scalar_lea.vmem %s184_s24, 512 }
   0xe   : > { %p756_p8 = pneg %p1102_p7  ;;  %s170_s27 = sshll.u32 %s1016_s26, 4  ;;  %s171_s27 = int_to_ptr.vmem [resolvable:$true] %s170_s27 }
   0xf   : > { %p857_p12 = scmp.ne.s32.totalorder %s184_s24, %s856_s28  ;;  %p864_p2 = scmp.lt.s32.totalorder %s184_s24, %s184_s24 }
  0x10   : > { %p1111_p10 = pnand %p756_p8, %p1331_p1  ;;  %p865_p4 = scmp.lt.s32.totalorder %s856_s28, %s856_s28 }
  0x12   : > { %p847_p11 = pneg %p1111_p10  ;;  %p866_p6 = por %p865_p4, %p864_p2 }
  0x14   : > { %p859_p13 = pnand %p857_p12, %p847_p11 }
  0x16   : > { %p860_p0 = pneg %p859_p13 }
  0x18   : > { %p867_p9 = pnand %p866_p6, %p860_p0 }
  0x1a   : > { %870 = shalt.err (!%p867_p9)
}
  0x1b   : > { %s1017_s29 = smov 128   ;;  %s1018_s30 = smov 8  }
  0x1c   : > { %762 = dma.hbm_to_vmem [thread:$0]  (!%p1111_p10), %s1329_s2, 512, %s184_s24, [#allocation7], %s1017_s29, %s1017_s29, %s1018_s30  }
  0x1d   : > { %s882_s6 = scalar_lea.vmem %s171_s27, 32  ;;  %p890_p1 = scmp.lt.s32.totalorder %s171_s27, %s171_s27 }
  0x1e   : > { %p883_p8 = scmp.ne.s32.totalorder %s171_s27, %s882_s6  ;;  %p891_p2 = scmp.lt.s32.totalorder %s882_s6, %s882_s6 }
  0x20   : > { %p885_p12 = pnand %p883_p8, %p847_p11  ;;  %p892_p0 = por %p891_p2, %p890_p1 }
  0x22   : > { %p886_p13 = pneg %p885_p12 }
  0x24   : > { %p893_p9 = pnand %p892_p0, %p886_p13 }
  0x26   : > { %896 = shalt.err (!%p893_p9)
}
  0x27   : > { %759 = dma.hbm_to_vmem [thread:$0]  (!%p1111_p10), %s1327_s0, 32, %s171_s27, [#allocation4]  }
  0x28   : > { %p141_p1 = scmp.eq.s32.totalorder %s1084_s18, 1  ;;  %s39_s9 = sadd.s32 1, %s1009_s16 }
  0x29   : > { %p41_p11 = scmp.ge.s32.totalorder %s39_s9, 2  ;;  %p81_p4 = scmp.ne.s32.totalorder %s1001_s14, %s997_s13 }
  0x2a   : > { %s74_s10 = sadd.s32 1, %s1001_s14  ;;  %p82_p6 = scmp.eq.s32.totalorder %s1013_s17, 0 }
  0x2b   : > { %s1349_s9 = smov (%p41_p11, %s39_s9), 0  ;;  %p1141_p8 = por %p141_p1, %p81_p4 }
  0x2c   : > { %p773_p12 = scmp.lt.s32.totalorder %s1013_s17, 2  ;;  %s69_s19 = ssub.s32 %s1009_s16, %s1349_s9 }
  0x2d   : > { %p83_p13 = por %p82_p6, %p81_p4  ;;  %p72_p2 = scmp.eq.s32.totalorder %s69_s19, 0 }
  0x2e   : > { %s197_s23 = sand.u32 1, %s1013_s17   ;;  %s199_s24 = sand.u32 1, %s1001_s14  }
  0x2f   : > { %s742_s25 = smul.u32 384, %s1009_s16  ;;  %p1154_p10 = pnand %p773_p12, %p83_p13 }
  0x30   : > { %s1152_s26 = scalar_select %p72_p2, %s1001_s14, %s74_s10  }
  0x31   : > { %s741_s27 = smul.u32 24, %s199_s24  ;;  %s209_s4 = scalar_lea.hbm %s1328_s1, %s742_s25 }
  0x32   : > { %s198_s7 = scalar_lea.sflag [#allocation7], %s197_s23  ;;  %p899_p0 = pneg %p1154_p10 }
  0x33   : > { %s201_s5 = scalar_lea.vmem [#allocation6], %s741_s27  ;;  %s1019_s10 = smov [#allocation6]  }
  0x34   : > { %s211_s6 = sshll.u32 %s201_s5, 4  ;;  %s915_s19 = sshll.u32 %s1019_s10, 4  ;;  %s212_s6 = int_to_ptr.vmem [resolvable:$true] %s211_s6  ;;  %s916_s19 = int_to_ptr.vmem [resolvable:$false] %s915_s19 }
  0x35   : > { %s910_s8 = scalar_lea.vmem %s212_s6, 384  ;;  %s917_s24 = scalar_lea.vmem %s916_s19, 768 }
  0x36   : > { %p911_p9 = scmp.ne.s32.totalorder %s212_s6, %s910_s8  ;;  %p918_p4 = scmp.lt.s32.totalorder %s212_s6, %s916_s19 }
  0x37   : > { %p919_p6 = scmp.lt.s32.totalorder %s917_s24, %s910_s8 }
  0x38   : > { %p913_p1 = pnand %p911_p9, %p899_p0 }
  0x39   : > { %p920_p12 = por %p919_p6, %p918_p4 }
  0x3a   : > { %p914_p11 = pneg %p913_p1 }
  0x3c   : > { %p921_p13 = pnand %p920_p12, %p914_p11 }
  0x3e   : > { %924 = shalt.err (!%p921_p13)
}
  0x3f   : > { %766 = dma.hbm_to_vmem [thread:$0]  (!%p1154_p10), %s209_s4, 384, %s212_s6, %s198_s7  }
  0x40   : > { %220 = sbr.rel (%p1102_p7) target bundleno = 456 (0x1c8), region = 32  ;;  %p1338_p2 = scmp.eq.s32.totalorder (!%p1102_p7), %s1084_s18, 0 }
  0x45   : > { %976 = dma.done.wait (%p1338_p2), [#allocation4], 32   ;;  %p1339_p0 = pmov %p1338_p2 }
  0x46   : > { %s226_s23 = sand.u32 1, %s1084_s18   ;;  %s1173_s25 = sand.u32 1, %s997_s13  }
  0x47   : > { %978 = vsyncadd (%p1339_p0), [#allocation4], 4294967264  ;;  %s743_s27 = smul.u32 24, %s1173_s25  ;;  %s227_s29 = scalar_lea.sflag [#allocation7], %s226_s23 }
  0x49   : > { %s230_s28 = scalar_lea.vmem [#allocation6], %s743_s27 }
  0x4a   : > { %980 = dma.done.wait (%p1092_p3), %s227_s29, 384  }
  0x4b   : > { %982 = vsyncadd (%p1092_p3), %s227_s29, 4294966912  ;;  %p1340_p7 = pmov %p1339_p0 }
  0x4c   : > { %p1341_p10 = pmov %p1339_p0 }
  0x4d   : > { %984 = dma.done.wait (%p1340_p7), [#allocation7], 512  }
  0x4e   : > { %986 = vsyncadd (%p1341_p10), [#allocation7], 4294966784  ;;  %v268_v0 = vlaneseq  ;;  %v1184_v2 = vld [vmem:[%s230_s28 + $0x8] sm:$0xff]  ;;  %v1186_v3 = vld [vmem:[%s230_s28] sm:$0xff]  ;;  %s1020_s22 = smov 94   ;;  %v1021_v8 = vmov 0  }
  0x4f   : > { %397 = vrot.lane.b32.xlu0 %v1184_v2, %s1020_s22  ;;  %395 = vrot.lane.b32.xlu1 %v1186_v3, %s1020_s22  ;;  %v264_v6 = vld [vmem:[#allocation3] sm:$0x3]  ;;  %v263_v7 = vld [vmem:[%s230_s28 + $0x10] sm:$0xff]  ;;  %s1022_s18 = smov 95   ;;  %s1023_s20 = smov 96   ;;  %v1027_v15 = vmov 0.0  }
  0x50   : > { %v269_v1 = vshrl.u32 %v268_v0, 7  ;;  %vm266_vm0 = vcmp.eq.s32.totalorder %v264_v6, 15  ;;  %vm265_vm1 = vcmp.eq.s32.totalorder %v264_v6, 0  ;;  %s1024_s30 = smov 110   ;;  %s1025_s4 = smov 111   ;;  %509 = vmatprep.mubr.f32.mxu0 %v1027_v15  ;;  %521 = vmatprep.mubr.f32.mxu1 %v1027_v15  ;;  %vm401_vm2 = vcmask 769024  }
  0x51   : > { %v298_v9 = vsel %vm266_vm0, 1, %v1021_v8  ;;  %v267_v10 = vsel %vm265_vm1, 1, %v1021_v8  ;;  %s1026_s5 = smov 112   ;;  %s1028_s6 = smov 126   ;;  %vm388_vm5 = vcmask 777216   ;;  %vm373_vm6 = vcmask 785408  }
  0x52   : > { %v274_v4 = vsub.s32 1, %v269_v1  ;;  %v270_v5 = vsub.s32 0, %v269_v1  ;;  %s1029_s7 = smov 127   ;;  %vm358_vm9 = vcmask 900096   ;;  %vm345_vm10 = vcmask 908288   ;;  %v410_v56 = vld [vmem:[#allocation8] sm:$0xff] }
  0x53   : > { %399 = vrot.lane.b32.xlu0 %v263_v7, %s1020_s22  ;;  %384 = vrot.lane.b32.xlu1 %v1184_v2, %s1022_s18  ;;  %vm330_vm11 = vcmask 916480   ;;  %vm315_vm12 = vcmask 1031168   ;;  %vm291_vm13 = vcmask 1039360   ;;  %vm432_vm14 = vcmask 588800   ;;  %v412_v57 = vld [vmem:[#allocation8 + $0x10] sm:$0xff]  ;;  %v411_v58 = vld [vmem:[#allocation8 + $0x8] sm:$0xff] }
  0x54   : > { %v1190_v11 = vrot.slane %v298_v9, %v274_v4  ;;  %v1192_v12 = vrot.slane %v298_v9, %v270_v5  ;;  %v1195_v13 = vrot.slane %v267_v10, %v274_v4  ;;  %v1197_v14 = vrot.slane %v267_v10, %v270_v5  ;;  %v413_v59 = vld [vmem:[#allocation8 + $0x18] sm:$0xff]  ;;  %s688_s8 = sshll.u32 %s1173_s25, 6  ;;  %s698_s24 = sshll.u32 %s1005_s15, 10 }
  0x55   : > { %s256_s10 = scalar_lea.vmem [#allocation9], %s688_s8  ;;  %s1279_s29 = scalar_lea.hbm %s1330_s3, %s698_s24 }
  0x56   : > { %vm776_vm3 = vcmp.ne.s32.totalorder %v1190_v11, 1  ;;  %vm777_vm4 = vcmp.ne.s32.totalorder %v1192_v12, 1  ;;  %vm778_vm7 = vcmp.ne.s32.totalorder %v1195_v13, 1  ;;  %vm779_vm8 = vcmp.ne.s32.totalorder %v1197_v14, 1  ;;  %s561_s19 = sshll.u32 %s256_s10, 4  ;;  %s543_s15 = scalar_lea.sflag [#allocation5], %s1173_s25  ;;  %s1274_s19 = int_to_ptr.vmem [resolvable:$true] %s561_s19 }
  0x57   : > { %386 = vrot.lane.b32.xlu0 %v263_v7, %s1022_s18  ;;  %382 = vrot.lane.b32.xlu1 %v1186_v3, %s1022_s18  ;;  %s925_s28 = scalar_lea.vmem %s1274_s19, 1024  ;;  %s1030_s22 = smov [#allocation9]  }
  0x58   : > { %p926_p3 = scmp.ne.s32.totalorder %s1274_s19, %s925_s28  ;;  %s929_s18 = sshll.u32 %s1030_s22, 4  ;;  %s930_s18 = int_to_ptr.vmem [resolvable:$false] %s929_s18 }
  0x59   : > { %p932_p11 = scmp.lt.s32.totalorder %s1274_s19, %s930_s18 }
  0x5a   : > { %p927_p9 = pnand %p926_p3, %p1141_p8 }
  0x5b   : > { %369 = vrot.lane.b32.xlu0 %v1184_v2, %s1023_s20  ;;  %371 = vrot.lane.b32.xlu1 %v263_v7, %s1023_s20 }
  0x5c   : > { %p928_p1 = pneg %p927_p9 }
  0x5f   : > { %367 = vrot.lane.b32.xlu0 %v1186_v3, %s1023_s20  ;;  %354 = vrot.lane.b32.xlu1 %v1184_v2, %s1024_s30  ;;  %s931_s20 = scalar_lea.vmem %s930_s18, 2048 }
  0x60   : > { %p933_p4 = scmp.lt.s32.totalorder %s931_s20, %s925_s28 }
  0x62   : > { %p934_p6 = por %p933_p4, %p932_p11 }
  0x63   : > { %356 = vrot.lane.b32.xlu0 %v263_v7, %s1024_s30  ;;  %352 = vrot.lane.b32.xlu1 %v1186_v3, %s1024_s30 }
  0x64   : > { %p935_p12 = pnand %p934_p6, %p928_p1 }
  0x67   : > { %341 = vrot.lane.b32.xlu0 %v1184_v2, %s1025_s4  ;;  %343 = vrot.lane.b32.xlu1 %v263_v7, %s1025_s4 }
  0x6b   : > { %339 = vrot.lane.b32.xlu0 %v1186_v3, %s1025_s4  ;;  %326 = vrot.lane.b32.xlu1 %v1184_v2, %s1026_s5 }
  0x6f   : > { %328 = vrot.lane.b32.xlu0 %v263_v7, %s1026_s5  ;;  %324 = vrot.lane.b32.xlu1 %v1186_v3, %s1026_s5 }
  0x73   : > { %311 = vrot.lane.b32.xlu0 %v1184_v2, %s1028_s6  ;;  %313 = vrot.lane.b32.xlu1 %v263_v7, %s1028_s6 }
  0x77   : > { %309 = vrot.lane.b32.xlu0 %v1186_v3, %s1028_s6  ;;  %287 = vrot.lane.b32.xlu1 %v1184_v2, %s1029_s7 }
  0x7b   : > { %289 = vrot.lane.b32.xlu0 %v263_v7, %s1029_s7  ;;  %285 = vrot.lane.b32.xlu1 %v1186_v3, %s1029_s7 }
  0xc1   : > { %v398_v16 = vpop.permute.xlu0 %397  ;;  %v396_v17 = vpop.permute.xlu1 %395 }
  0xc2   : > { %v402_v21 = vsel %vm401_vm2, %v396_v17, %v398_v16 }
  0xc5   : > { %v400_v18 = vpop.permute.xlu0 %399  ;;  %v385_v19 = vpop.permute.xlu1 %384 }
  0xc6   : > { %v403_v20 = vsel %vm401_vm2, %v398_v16, %v400_v18 }
  0xc7   : > { %700 = vmatprep.subr.msk.mxu0 %vm776_vm3, %v403_v20  ;;  %723 = vmatprep.subr.msk.mxu1 %vm776_vm3, %v403_v20 }
  0xc8   : > { %702 = vmatpush1.msk.msra.mxu0 %vm777_vm4, %v402_v21  ;;  %732 = vmatpush1.msk.msra.mxu1 %vm777_vm4, %v402_v21 }
  0xc9   : > { %v387_v22 = vpop.permute.xlu0 %386  ;;  %v383_v23 = vpop.permute.xlu1 %382 }
  0xca   : > { %v390_v24 = vsel %vm388_vm5, %v385_v19, %v387_v22  ;;  %v389_v25 = vsel %vm388_vm5, %v383_v23, %v385_v19 }
  0xcb   : > { %461 = vmatprep.subr.mxu0 %v390_v24  ;;  %724 = vmatprep.subr.mxu1 %v390_v24 }
  0xcc   : > { %462 = vmatpush1.msra.mxu0 %v389_v25  ;;  %733 = vmatpush1.msra.mxu1 %v389_v25 }
  0xcd   : > { %v370_v26 = vpop.permute.xlu0 %369  ;;  %v372_v27 = vpop.permute.xlu1 %371 }
  0xce   : > { %v375_v28 = vsel %vm373_vm6, %v370_v26, %v372_v27 }
  0xcf   : > { %704 = vmatprep.subr.msk.mxu0 %vm778_vm7, %v375_v28  ;;  %725 = vmatprep.subr.msk.mxu1 %vm778_vm7, %v375_v28 }
  0xd1   : > { %v368_v29 = vpop.permute.xlu0 %367  ;;  %v355_v30 = vpop.permute.xlu1 %354 }
  0xd2   : > { %v374_v31 = vsel %vm373_vm6, %v368_v29, %v370_v26 }
  0xd3   : > { %706 = vmatpush1.msk.msra.mxu0 %vm779_vm8, %v374_v31  ;;  %734 = vmatpush1.msk.msra.mxu1 %vm779_vm8, %v374_v31 }
  0xd5   : > { %v357_v32 = vpop.permute.xlu0 %356  ;;  %v353_v33 = vpop.permute.xlu1 %352 }
  0xd6   : > { %v360_v34 = vsel %vm358_vm9, %v355_v30, %v357_v32  ;;  %v359_v35 = vsel %vm358_vm9, %v353_v33, %v355_v30 }
  0xd7   : > { %708 = vmatprep.subr.msk.mxu0 %vm776_vm3, %v360_v34  ;;  %726 = vmatprep.subr.msk.mxu1 %vm776_vm3, %v360_v34 }
  0xd8   : > { %710 = vmatpush1.msk.msra.mxu0 %vm777_vm4, %v359_v35  ;;  %735 = vmatpush1.msk.msra.mxu1 %vm777_vm4, %v359_v35 }
  0xd9   : > { %v342_v36 = vpop.permute.xlu0 %341  ;;  %v344_v37 = vpop.permute.xlu1 %343 }
  0xda   : > { %v347_v38 = vsel %vm345_vm10, %v342_v36, %v344_v37 }
  0xdb   : > { %467 = vmatprep.subr.mxu0 %v347_v38  ;;  %727 = vmatprep.subr.mxu1 %v347_v38 }
  0xdd   : > { %v340_v39 = vpop.permute.xlu0 %339  ;;  %v327_v40 = vpop.permute.xlu1 %326 }
  0xde   : > { %v346_v41 = vsel %vm345_vm10, %v340_v39, %v342_v36 }
  0xdf   : > { %468 = vmatpush1.msra.mxu0 %v346_v41  ;;  %736 = vmatpush1.msra.mxu1 %v346_v41 }
  0xe1   : > { %v329_v42 = vpop.permute.xlu0 %328  ;;  %v325_v43 = vpop.permute.xlu1 %324 }
  0xe2   : > { %v332_v44 = vsel %vm330_vm11, %v327_v40, %v329_v42  ;;  %v331_v45 = vsel %vm330_vm11, %v325_v43, %v327_v40 }
  0xe3   : > { %712 = vmatprep.subr.msk.mxu0 %vm778_vm7, %v332_v44  ;;  %728 = vmatprep.subr.msk.mxu1 %vm778_vm7, %v332_v44 }
  0xe4   : > { %714 = vmatpush1.msk.msra.mxu0 %vm779_vm8, %v331_v45  ;;  %737 = vmatpush1.msk.msra.mxu1 %vm779_vm8, %v331_v45 }
  0xe5   : > { %v312_v46 = vpop.permute.xlu0 %311  ;;  %v314_v47 = vpop.permute.xlu1 %313 }
  0xe6   : > { %v317_v48 = vsel %vm315_vm12, %v312_v46, %v314_v47 }
  0xe7   : > { %716 = vmatprep.subr.msk.mxu0 %vm776_vm3, %v317_v48  ;;  %729 = vmatprep.subr.msk.mxu1 %vm776_vm3, %v317_v48 }
  0xe9   : > { %v310_v49 = vpop.permute.xlu0 %309  ;;  %v288_v50 = vpop.permute.xlu1 %287 }
  0xea   : > { %v316_v51 = vsel %vm315_vm12, %v310_v49, %v312_v46 }
  0xeb   : > { %718 = vmatpush1.msk.msra.mxu0 %vm777_vm4, %v316_v51  ;;  %738 = vmatpush1.msk.msra.mxu1 %vm777_vm4, %v316_v51 }
  0xed   : > { %v290_v52 = vpop.permute.xlu0 %289  ;;  %v286_v53 = vpop.permute.xlu1 %285 }
  0xee   : > { %v293_v54 = vsel %vm291_vm13, %v288_v50, %v290_v52  ;;  %v292_v55 = vsel %vm291_vm13, %v286_v53, %v288_v50 }
  0xef   : > { %473 = vmatprep.subr.mxu0 %v293_v54  ;;  %730 = vmatprep.subr.mxu1 %v293_v54 }
  0xf0   : > { %474 = vmatpush1.msra.mxu0 %v292_v55  ;;  %739 = vmatpush1.msra.mxu1 %v292_v55 }
  0xf1   : > { %720 = vmatprep.subr.msk.mxu0 %vm778_vm7, %v1184_v2  ;;  %731 = vmatprep.subr.msk.mxu1 %vm778_vm7, %v1184_v2 }
  0xf2   : > { %722 = vmatpush1.msk.msra.mxu0 %vm779_vm8, %v1186_v3  ;;  %740 = vmatpush1.msk.msra.mxu1 %vm779_vm8, %v1186_v3 }
  0xf3   : > { %689 = vmatmul.mubr.msk.f32.vlgmr.msra.gmra.mxu0 %vm432_vm14, %v410_v56  ;;  %691 = vmatmul.mubr.msk.f32.vlgmr.msra.gmra.mxu1 %vm432_vm14, %v412_v57 }
  0xf4   : > { %515 = vmatprep.mubr.f32.mxu0 %v1027_v15  ;;  %527 = vmatprep.mubr.f32.mxu1 %v1027_v15 }
  0xf7   : > { %690 = vmatmul.mubr.msk.f32.gmra.mxu0 %vm432_vm14, %v411_v58  ;;  %692 = vmatmul.mubr.msk.f32.gmra.mxu1 %vm432_vm14, %v413_v59 }
 0x1b3   : > { %v511_v60 = vpop.f32.mrf.mxu0  ;;  %v523_v61 = vpop.f32.mrf.mxu1 }
 0x1b4   : > { %534 = vst [vmem:[%s256_s10] sm:$0xff] %v511_v60  ;;  %538 = vst [vmem:[%s256_s10 + $0x20] sm:$0xff] %v523_v61 }
 0x1b5   : > { %v513_v62 = vpop.f32.mrf.mxu0  ;;  %v525_v63 = vpop.f32.mrf.mxu1 }
 0x1b6   : > { %535 = vst [vmem:[%s256_s10 + $0x8] sm:$0xff] %v513_v62  ;;  %539 = vst [vmem:[%s256_s10 + $0x28] sm:$0xff] %v525_v63 }
 0x1b7   : > { %v517_v0 = vpop.f32.mrf.mxu0  ;;  %v529_v1 = vpop.f32.mrf.mxu1 }
 0x1b8   : > { %536 = vst [vmem:[%s256_s10 + $0x10] sm:$0xff] %v517_v0  ;;  %540 = vst [vmem:[%s256_s10 + $0x30] sm:$0xff] %v529_v1 }
 0x1b9   : > { %v519_v2 = vpop.f32.mrf.mxu0  ;;  %v531_v3 = vpop.f32.mrf.mxu1 }
 0x1ba   : > { %537 = vst [vmem:[%s256_s10 + $0x18] sm:$0xff] %v519_v2  ;;  %541 = vst [vmem:[%s256_s10 + $0x38] sm:$0xff] %v531_v3 }
 0x1bb   : > { %938 = shalt.err (!%p935_p12)
}
 0x1bc   : > { %s939_s30 = scalar_lea.hbm %s1279_s29, 1024  ;;  %s943_s6 = scalar_lea.hbm %s1330_s3, 2048 }
 0x1bd   : > { %p940_p13 = scmp.ne.s32.totalorder %s1279_s29, %s939_s30  ;;  %p944_p7 = scmp.lt.s32.totalorder %s1279_s29, %s1330_s3 }
 0x1be   : > { %p945_p10 = scmp.lt.s32.totalorder %s943_s6, %s939_s30 }
 0x1bf   : > { %p941_p2 = pnand %p940_p13, %p1141_p8 }
 0x1c0   : > { %p946_p3 = por %p945_p10, %p944_p7 }
 0x1c1   : > { %p942_p0 = pneg %p941_p2 }
 0x1c3   : > { %p947_p9 = pnand %p946_p3, %p942_p0 }
 0x1c5   : > { %950 = shalt.err (!%p947_p9)
}
 0x1c6   : > { %s1031_s10 = smov 256   ;;  %s1032_s24 = smov 16  }
 0x1c7   : > { %754 = dma.vmem_to_hbm [thread:$0]  (%p1141_p8), %s1274_s19, 1024, %s1279_s29, %s543_s15, %s1031_s10, %s1031_s10, %s1032_s24  }
 0x1c8 PF: > { %s576_s23 = sand.u32 1, %s993_s12   ;;  %p1342_p1 = scmp.ge.s32.totalorder %s1013_s17, 2 }
 0x1c9   : > { %s577_s27 = scalar_lea.sflag [#allocation5], %s576_s23 }
 0x1ca   : > { %p768_p11 = pnand %p1342_p1, %p1097_p5 }
 0x1cc   : > { %p769_p4 = pneg %p768_p11 }
 0x1ce   : > { %988 = dma.done.wait (%p769_p4), %s577_s27, 1024  }
 0x1cf   : > { %990 = vsyncadd (%p769_p4), %s577_s27, 4294966272  ;;  %s20_s17 = sadd.s32 1, %s1013_s17   ;;  %s1343_s12 = smov %s997_s13 }
 0x1d0   : > { %p17_p6 = scmp.ge.s32.totalorder %s20_s17, 4   ;;  %s1344_s13 = smov %s1001_s14 }
 0x1d1   : > { %s1345_s14 = smov %s1152_s26  ;;  %s1346_s15 = smov %s1009_s16 }
 0x1d2   : > { %s1347_s16 = smov %s1349_s9  ;;  %19 = sbr.rel (!%p17_p6) target bundleno = 7 (0x7), region = 88 }
 0x1d7   :  { %582 = vsyncpa [#allocation4], 1 }
 0x1d8   :  { %584 = vsyncpa [#allocation4 + $0x1], 1 }
 0x1d9   :  { %585 = vsyncpa [#allocation7], 1 }
 0x1da   :  { %587 = vsyncpa [#allocation7 + $0x1], 1 }
 0x1db   :  { %588 = vsyncpa [#allocation5], 1 }
 0x1dc   :  { %590 = vsyncpa [#allocation5 + $0x1], 1 }

</bundles_post_ra>
